<compile_context>
chip_gen: v6e
topology: v6e:2x2x1
jax: 0.10.0
libtpu: 0.0.40
codegen_flags: <defaults>
</compile_context>

<pallas_src>
import jax
import jax.numpy as jnp
from jax.experimental import pallas as pl
from jax.experimental.pallas import tpu as pltpu

_NEG_SLOPE = 0.01  # PyTorch F.leaky_relu default negative_slope
_OUT = 5
_LANE = 128


def _mlp_l_kernel(x_ref, w_ref, b_ref, o_ref, acc_ref):
    # x_ref: (TB, TK)  w_ref: (TK, 5)  b_ref: (1, 5)  o_ref: (TB, 5)
    # acc_ref: (TB, 5) f32 scratch, persists across the K (reduction) axis.
    k = pl.program_id(1)
    nk = pl.num_programs(1)

    @pl.when(k == 0)
    def _init():
        acc_ref[...] = jnp.zeros_like(acc_ref)

    # MXU matmul at native input dtype, f32 accumulation.
    acc_ref[...] += jnp.dot(x_ref[...], w_ref[...],
                            preferred_element_type=jnp.float32)

    @pl.when(k == nk - 1)
    def _epilogue():
        z = acc_ref[...] + b_ref[...].astype(jnp.float32)
        # LeakyReLU (slope 0.01, PyTorch default) as a single mul+max.
        z = jnp.maximum(z, _NEG_SLOPE * z)
        # Numerically stable softmax over the 5-wide last axis (== dim=1).
        z = z - jnp.max(z, axis=-1, keepdims=True)
        e = jnp.exp(z)
        denom = jnp.sum(e, axis=-1, keepdims=True)
        # Exact divide: kernel is HBM-bound, approx reciprocal is not worth the
        # row-sum error it introduces.
        o_ref[...] = (e / denom).astype(o_ref.dtype)


def _round_up(x, m):
    return ((x + m - 1) // m) * m


def _detect_vmem_capacity_bytes():
    try:
        cap = getattr(pltpu.get_tpu_info(), "vmem_capacity_bytes", None)
        if cap:
            return int(cap)
    except Exception:
        pass
    return 64 << 20  # conservative fallback: v7x physical VMEM per TensorCore


_BUFFERED = getattr(pl, "Buffered", None)


def _resident_spec(shape, index_map):
    """BlockSpec with a constant index_map -> single-buffer it if supported."""
    if _BUFFERED is not None:
        try:
            return pl.BlockSpec(shape, index_map, pipeline_mode=_BUFFERED(1))
        except TypeError:
            pass
    return pl.BlockSpec(shape, index_map)


def _choose_tk(N, itemsize, budget, max_k_tile):
    """Reduction tile over n_mlp. Use full N unless the lane-padded
    (N,5)->(N,128) weight slab would eat the VMEM budget, in which case pick a
    multiple of 128 that divides N (so no garbage rows enter the reduction)."""
    cap_rows = N if max_k_tile is None else min(N, max_k_tile)
    w_cap_bytes = min(budget // 8, 8 << 20)  # resident-weight allowance
    if N * _LANE * itemsize <= w_cap_bytes and cap_rows >= N:
        return N
    # A K-tiled weight slice is double-buffered -> 2 buffers per slice.
    rows_by_bytes = max(_LANE, w_cap_bytes // (2 * _LANE * itemsize))
    cap_rows = max(_LANE, (min(cap_rows, rows_by_bytes) // _LANE) * _LANE)
    tk = cap_rows
    while tk >= _LANE:
        if N % tk == 0:
            return tk
        tk -= _LANE
    return N  # no clean 128-multiple divisor: fall back to a single K step


def mlp_l_forward(x, weight_t, bias, *, max_tile=4096,
                  vmem_capacity_bytes=None, max_k_tile=None):
    """x: (B, n_mlp), weight_t: (n_mlp, 5), bias: (5,) -> (B, 5) softmax weights."""
    B, N = x.shape
    assert weight_t.shape == (N, _OUT)
    assert bias.shape == (_OUT,)
    itemsize = jnp.dtype(x.dtype).itemsize
    # Sublane pack: 8 rows for 32-bit, 16 for bf16, 32 for int8/fp8.
    pack = max(1, 4 // itemsize) * 8

    if vmem_capacity_bytes is None:
        vmem_capacity_bytes = _detect_vmem_capacity_bytes()
    budget = int(0.70 * vmem_capacity_bytes)      # working-set target
    vmem_limit = int(0.85 * vmem_capacity_bytes)  # compiler scoped-VMEM limit

    TK = _choose_tk(N, itemsize, budget, max_k_tile)
    n_k = N // TK if (TK != 0 and N % TK == 0) else 1
    if n_k == 1:
        TK = N

    # Resident (TB-independent) VMEM: weight slice(s) lane-padded to 128 lanes,
    # bias padded to one (8,128) f32 tile.
    w_bufs = 1 if n_k == 1 else 2
    resident = w_bufs * TK * _LANE * itemsize + 8 * _LANE * 4
    # Per-batch-row VMEM: double-buffered x row (lane padded) + double-buffered
    # f32 output row + f32 accumulator row (all padded to 128 lanes).
    per_row = 2 * _round_up(TK, _LANE) * itemsize + 3 * _LANE * 4

    b_full = _round_up(B, pack)
    rows_fit = max(pack, ((budget - resident) // per_row // pack) * pack)
    TB = max(pack, min(max_tile, rows_fit, b_full))
    # v7x has 2 TensorCores: if a large batch would fit a single tile, split it
    # so the "parallel" batch axis feeds both cores. Only when each half-tile
    # stays >=512 rows so per-step overhead remains hidden on v5e/v6e too.
    if TB >= b_full and B >= 1024:
        TB = _round_up(-(-B // 2), pack)

    grid = (pl.cdiv(B, TB), n_k)
    bias2d = bias.reshape(1, _OUT)

    if n_k == 1:
        w_spec = _resident_spec((TK, _OUT), lambda i, k: (0, 0))
    else:
        w_spec = pl.BlockSpec((TK, _OUT), lambda i, k: (k, 0))

    cost = pl.CostEstimate(
        flops=2 * B * N * _OUT,
        transcendentals=B * _OUT,
        bytes_accessed=(B * N + N * _OUT) * itemsize + B * _OUT * 4 + _OUT * 4,
    )

    return pl.pallas_call(
        _mlp_l_kernel,
        out_shape=jax.ShapeDtypeStruct((B, _OUT), jnp.float32),
        grid_spec=pltpu.PrefetchScalarGridSpec(
            num_scalar_prefetch=0,
            grid=grid,
            in_specs=[
                pl.BlockSpec((TB, TK), lambda i, k: (i, k)),      # x: tiled + pipelined
                w_spec,                                           # weight: resident / K-sliced
                _resident_spec((1, _OUT), lambda i, k: (0, 0)),   # bias: resident
            ],
            out_specs=pl.BlockSpec((TB, _OUT), lambda i, k: (i, 0)),
            scratch_shapes=[pltpu.VMEM((TB, _OUT), jnp.float32)],
        ),
        compiler_params=pltpu.CompilerParams(
            dimension_semantics=("parallel", "arbitrary"),
            vmem_limit_bytes=vmem_limit,
        ),
        cost_estimate=cost,
    )(x, weight_t, bias2d)


def _reference(x, weight_t, bias):
    z = x @ weight_t + bias
    z = jnp.where(z >= 0, z, _NEG_SLOPE * z)
    return jax.nn.softmax(z, axis=1)


if __name__ == "__main__":
    key = jax.random.PRNGKey(0)

    # --- smoke test at small shapes implied by the module (B=8, n_mlp=32) ---
    B, n_mlp = 8, 32
    kx, kw, kb = jax.random.split(key, 3)
    x = jax.random.normal(kx, (B, n_mlp), dtype=jnp.float32)
    # PyTorch Linear default init: U(-1/sqrt(fan_in), 1/sqrt(fan_in)).
    bound = 1.0 / (n_mlp ** 0.5)
    weight = jax.random.uniform(kw, (5, n_mlp), minval=-bound, maxval=bound,
                                dtype=jnp.float32)               # PyTorch (out, in)
    bias = jax.random.uniform(kb, (5,), minval=-bound, maxval=bound,
                              dtype=jnp.float32)
    weight_t = weight.T                                           # (n_mlp, 5)

    out = mlp_l_forward(x, weight_t, bias)
    jax.block_until_ready(out)
    ref = _reference(x, weight_t, bias)
    assert out.shape == (B, _OUT)
    assert jnp.allclose(out, ref, atol=1e-4, rtol=1e-4), "mismatch vs reference"
    assert jnp.allclose(jnp.sum(out, axis=1), 1.0, atol=1e-5), "softmax rows != 1"

    # --- exercise the K-tiled (reduction-axis) path as well ---
    B2, n_mlp2 = 64, 512
    k2x, k2w, k2b = jax.random.split(jax.random.PRNGKey(1), 3)
    x2 = jax.random.normal(k2x, (B2, n_mlp2), dtype=jnp.float32)
    bound2 = 1.0 / (n_mlp2 ** 0.5)
    w2 = jax.random.uniform(k2w, (5, n_mlp2), minval=-bound2, maxval=bound2,
                            dtype=jnp.float32)
    b2 = jax.random.uniform(k2b, (5,), minval=-bound2, maxval=bound2,
                            dtype=jnp.float32)
    out2 = mlp_l_forward(x2, w2.T, b2, max_k_tile=256)            # forces 2 K steps
    jax.block_until_ready(out2)
    ref2 = _reference(x2, w2.T, b2)
    assert out2.shape == (B2, _OUT)
    assert jnp.allclose(out2, ref2, atol=1e-4, rtol=1e-4), "K-tiled mismatch vs reference"
    assert jnp.allclose(jnp.sum(out2, axis=1), 1.0, atol=1e-5), "K-tiled softmax rows != 1"

    print("KERNEL_OK")
</pallas_src>

<mosaic_0001>
module attributes {stable_mosaic.version = 11 : i64} {
  func.func @_mlp_l_kernel(%arg0: i32, %arg1: i32, %arg2: memref<8x32xf32, #tpu.memory_space<vmem>>, %arg3: memref<32x5xf32, #tpu.memory_space<vmem>>, %arg4: memref<1x5xf32, #tpu.memory_space<vmem>>, %arg5: memref<8x5xf32, #tpu.memory_space<vmem>>, %arg6: memref<8x5xf32, #tpu.memory_space<vmem>>) attributes {dimension_semantics = [#tpu.dimension_semantics<parallel>, #tpu.dimension_semantics<arbitrary>], iteration_bounds = array<i64: 1, 1>, scalar_prefetch = 0 : i64, scratch_operands = 1 : i64, tpu.core_type = #tpu.core_type<tc>, window_params = [{transform_indices = @transform_0, window_bounds = array<i64: 8, 32>}, {pipeline_mode = #tpu.pipeline_mode<synchronous>, transform_indices = @transform_1, window_bounds = array<i64: 32, 5>}, {pipeline_mode = #tpu.pipeline_mode<synchronous>, transform_indices = @transform_2, window_bounds = array<i64: 1, 5>}, {transform_indices = @transform_3, window_bounds = array<i64: 8, 5>}]} {
    %c0_i32 = arith.constant 0 : i32
    %0 = arith.cmpi eq, %arg1, %c0_i32 : i32
    %1 = arith.extui %0 : i1 to i32
    %c0_i32_0 = arith.constant 0 : i32
    %2 = arith.cmpi ne, %1, %c0_i32_0 : i32
    scf.if %2 {
      %cst_10 = arith.constant 0.000000e+00 : f32
      %12 = vector.broadcast %cst_10 : f32 to vector<8x5xf32>
      %c0_11 = arith.constant 0 : index
      %c0_12 = arith.constant 0 : index
      %13 = vector.load %arg6[%c0_11, %c0_12] : memref<8x5xf32, #tpu.memory_space<vmem>>, vector<8x5xf32>
      tpu.vector_store %arg6[%c0_11, %c0_12], %12 {strides = array<i32>} : memref<8x5xf32, #tpu.memory_space<vmem>>, vector<8x5xf32>,
    } else {
    }
    %c0 = arith.constant 0 : index
    %c0_1 = arith.constant 0 : index
    %3 = vector.load %arg6[%c0, %c0_1] : memref<8x5xf32, #tpu.memory_space<vmem>>, vector<8x5xf32>
    %c0_2 = arith.constant 0 : index
    %c0_3 = arith.constant 0 : index
    %4 = vector.load %arg2[%c0_2, %c0_3] : memref<8x32xf32, #tpu.memory_space<vmem>>, vector<8x32xf32>
    %c0_4 = arith.constant 0 : index
    %c0_5 = arith.constant 0 : index
    %5 = vector.load %arg3[%c0_4, %c0_5] : memref<32x5xf32, #tpu.memory_space<vmem>>, vector<32x5xf32>
    %cst = arith.constant dense<0.000000e+00> : vector<8x5xf32>
    %6 = tpu.matmul %4, %5, %cst {dimension_numbers = #tpu.dot_dimension_numbers<[1], [0], [0], [1], [0, 0, 1, 1], [], []>} : vector<8x32xf32>, vector<32x5xf32>, vector<8x5xf32> -> vector<8x5xf32>
    %7 = arith.addf %3, %6 : vector<8x5xf32>
    %c0_6 = arith.constant 0 : index
    %c0_7 = arith.constant 0 : index
    %8 = vector.load %arg6[%c0_6, %c0_7] : memref<8x5xf32, #tpu.memory_space<vmem>>, vector<8x5xf32>
    tpu.vector_store %arg6[%c0_6, %c0_7], %7 {strides = array<i32>} : memref<8x5xf32, #tpu.memory_space<vmem>>, vector<8x5xf32>,
    %c0_i32_8 = arith.constant 0 : i32
    %9 = arith.cmpi eq, %arg1, %c0_i32_8 : i32
    %10 = arith.extui %9 : i1 to i32
    %c0_i32_9 = arith.constant 0 : i32
    %11 = arith.cmpi ne, %10, %c0_i32_9 : i32
    scf.if %11 {
      %c0_10 = arith.constant 0 : index
      %c0_11 = arith.constant 0 : index
      %12 = vector.load %arg6[%c0_10, %c0_11] : memref<8x5xf32, #tpu.memory_space<vmem>>, vector<8x5xf32>
      %c0_12 = arith.constant 0 : index
      %c0_13 = arith.constant 0 : index
      %13 = vector.load %arg4[%c0_12, %c0_13] : memref<1x5xf32, #tpu.memory_space<vmem>>, vector<1x5xf32>
      %14 = vector.broadcast %13 : vector<1x5xf32> to vector<8x5xf32>
      %15 = arith.addf %12, %14 : vector<8x5xf32>
      %cst_14 = arith.constant 0.00999999977 : f32
      %16 = vector.broadcast %cst_14 : f32 to vector<8x5xf32>
      %17 = arith.mulf %16, %15 : vector<8x5xf32>
      %18 = arith.maximumf %15, %17 : vector<8x5xf32>
      %cst_15 = arith.constant dense<0xFF800000> : vector<8xf32>
      %19 = vector.multi_reduction <maximumf>, %18, %cst_15 [1] : vector<8x5xf32> to vector<8xf32>
      %20 = vector.shape_cast %19 : vector<8xf32> to vector<8x1xf32>
      %21 = vector.broadcast %20 : vector<8x1xf32> to vector<8x5xf32>
      %22 = arith.subf %18, %21 : vector<8x5xf32>
      %23 = math.exp %22 : vector<8x5xf32>
      %cst_16 = arith.constant dense<0.000000e+00> : vector<8xf32>
      %24 = vector.multi_reduction <add>, %23, %cst_16 [1] : vector<8x5xf32> to vector<8xf32>
      %25 = vector.shape_cast %24 : vector<8xf32> to vector<8x1xf32>
      %26 = vector.broadcast %25 : vector<8x1xf32> to vector<8x5xf32>
      %27 = arith.divf %23, %26 : vector<8x5xf32>
      %c0_17 = arith.constant 0 : index
      %c0_18 = arith.constant 0 : index
      %28 = vector.load %arg5[%c0_17, %c0_18] : memref<8x5xf32, #tpu.memory_space<vmem>>, vector<8x5xf32>
      tpu.vector_store %arg5[%c0_17, %c0_18], %27 {strides = array<i32>} : memref<8x5xf32, #tpu.memory_space<vmem>>, vector<8x5xf32>,
    } else {
    }
    return
  }
  func.func @transform_0(%arg0: i32, %arg1: i32) -> (i32, i32) {
    %c0_i32 = arith.constant 0 : i32
    return %arg0, %arg1 : i32, i32
  }
  func.func @transform_1(%arg0: i32, %arg1: i32) -> (i32, i32) {
    %c0_i32 = arith.constant 0 : i32
    %c0_i32_0 = arith.constant 0 : i32
    %c0_i32_1 = arith.constant 0 : i32
    return %c0_i32, %c0_i32_0 : i32, i32
  }
  func.func @transform_2(%arg0: i32, %arg1: i32) -> (i32, i32) {
    %c0_i32 = arith.constant 0 : i32
    %c0_i32_0 = arith.constant 0 : i32
    %c0_i32_1 = arith.constant 0 : i32
    return %c0_i32, %c0_i32_0 : i32, i32
  }
  func.func @transform_3(%arg0: i32, %arg1: i32) -> (i32, i32) {
    %c0_i32 = arith.constant 0 : i32
    %c0_i32_0 = arith.constant 0 : i32
    return %arg0, %c0_i32 : i32, i32
  }
}

</mosaic_0001>

<bundles_post_ra>
// kernel: tpu_custom_call.1
= control target key start
LH: loop header
LB: loop body
LE: loop exit
PB: predicated region body
PF: predicated region fallthrough
CT: control target
= control target key end

     0   :  { %v191_v1 = vmov 0.0   ;;  %vm192_vm0 = vmmov 0   ;;  %vm19_vm1 = vcmask 39936   ;;  %s240_s0 = inlined_call_operand.vmem [shape: f32[8,32], index: 0, kind: input, shape index: {}]   ;;  %s241_s1 = inlined_call_operand.vmem [shape: f32[32,5], index: 1, kind: input, shape index: {}]   ;;  %s242_s2 = inlined_call_operand.vmem [shape: f32[1,5], index: 2, kind: input, shape index: {}]   ;;  %s243_s3 = inlined_call_operand.hbm [shape: f32[8,5], index: 3, kind: output, shape index: {}]  }
   0x1   :  { %v26_v0 = vld [vmem:[%s241_s1 + $0x18] sm:$0xff]  ;;  %151 = vmatprep.subr.mxu0 %v191_v1  ;;  %v25_v2 = vld [vmem:[%s241_s1 + $0x10] sm:$0xff]  ;;  %159 = vmatprep.mubr.msk.f32.mxu0 %vm192_vm0, %v191_v1 }
   0x2   :  { %8 = vsyncpa [#allocation4], 0  ;;  %152 = vmatpush3.msra.mxu0 %v26_v0  ;;  %20 = vst.msk [vmem:[#allocation2] sm:$0xff] %vm19_vm1, %v191_v1  ;;  %v24_v3 = vld [vmem:[%s241_s1 + $0x8] sm:$0xff]  ;;  %v23_v4 = vld [vmem:[%s241_s1] sm:$0xff]  ;;  %vm27_vm2 = vcmask 261120  }
   0x3   :  { %153 = vmatprep.subr.mxu0 %v191_v1  ;;  %v22_v5 = vld [vmem:[%s240_s0] sm:$0xff]  ;;  %s193_s0 = smov [#allocation3]  }
   0x4   :  { %154 = vmatpush3.msra.mxu0 %v25_v2  ;;  %v145_v10 = vld [vmem:[%s242_s2] ss:$0 sm:$0xff]  ;;  %s136_s1 = sshll.u32 %s193_s0, 4  ;;  %s137_s1 = int_to_ptr.vmem [resolvable:$true] %s136_s1 }
   0x5   :  { %155 = vmatprep.subr.mxu0 %v191_v1  ;;  %s169_s2 = scalar_lea.vmem %s137_s1, 128  ;;  %p174_p1 = scmp.lt.s32.totalorder %s137_s1, %s137_s1 }
   0x6   :  { %156 = vmatpush3.msra.mxu0 %v24_v3  ;;  %p170_p0 = scmp.ne.s32.totalorder %s137_s1, %s169_s2  ;;  %p175_p2 = scmp.lt.s32.totalorder %s169_s2, %s169_s2 }
   0x7   :  { %157 = vmatprep.subr.mxu0 %v191_v1 }
   0x8   :  { %158 = vmatpush3.msra.mxu0 %v23_v4  ;;  %p176_p3 = por %p175_p2, %p174_p1 }
   0x9   :  { %160 = vmatmul.mubr.msk.f32.vlgmr.msra.gmra.mxu0 %vm27_vm2, %v22_v5  ;;  %v21_v6 = vld [vmem:[#allocation2] sm:$0xff] }
   0xa   :  { %p177_p4 = pnand %p176_p3, %p170_p0 }
  0xc9   :  { %v97_v7 = vpop.f32.mrf.mxu0 }
  0xca   :  { %v101_v8 = vadd.f32 %v97_v7, %v21_v6 }
  0xcb   :  { %v161_v9 = vpop.f32.mrf.mxu0 }
  0xcc   :  { %103 = vst.msk [vmem:[#allocation2] sm:$0xff] %vm19_vm1, %v101_v8 }
  0xd3   :  { %v107_v11 = vld [vmem:[#allocation2] sm:$0xff] }
  0xd4   :  { %v115_v12 = vadd.f32 %v145_v10, %v107_v11 }
  0xd6   :  { %v116_v13 = vmul.f32 0.01, %v115_v12 }
  0xd8   :  { %v117_v14 = vmax.f32 %v115_v12, %v116_v13 }
  0xda   :  { %v118_v15 = vsel %vm19_vm1, %v117_v14, -inf }
  0xdb   :  { %119 = vmax.xlane.f32.xlu0 %v118_v15 }
 0x164   :  { %v120_v16 = vpop.xlane.xlu0 %119 }
 0x165   :  { %v121_v17 = vsub.f32 %v117_v14, %v120_v16 }
 0x167   :  { %v122_v18 = vmul.f32 1.442695, %v121_v17 }
 0x169   :  { %165 = vpow2.f32 %v122_v18 }
 0x176   :  { %v166_v19 = vpop.eup %165 }
 0x177   :  { %v124_v20 = vsel %vm19_vm1, %v166_v19, 0.0 }
 0x178   :  { %125 = vadd.xlane.f32.xlu0 %v124_v20 }
 0x201   :  { %v126_v21 = vpop.xlane.xlu0 %125 }
 0x202   :  { %167 = vrcp.f32 %v126_v21 }
 0x20f   :  { %v168_v22 = vpop.eup %167 }
 0x210   :  { %v128_v23 = vmul.f32 %v168_v22, %v166_v19 }
 0x212   :  { %129 = vst.msk [vmem:[#allocation3] sm:$0xff] %vm19_vm1, %v128_v23 }
 0x213   :  { %180 = shalt.err (!%p177_p4)
}
 0x214   :  { %139 = dma.vmem_to_hbm [thread:$0]  %s137_s1, 128, %s243_s3, [#allocation4]  }
 0x215   :  { %189 = dma.done.wait [#allocation4], 128  }
 0x216   :  { %190 = vsyncadd [#allocation4], 4294967168 }
 0x217   :  { %143 = vsyncpa [#allocation4], 1 }

</bundles_post_ra>
